<compile_context>
chip_gen: v7x
topology: tpu7x:2x2x1
jax: 0.10.0
libtpu: 0.0.40
codegen_flags: <defaults>
</compile_context>

<pallas_src>
import functools
import math

import jax
import jax.numpy as jnp
from jax import lax
from jax.experimental import pallas as pl
from jax.experimental.pallas import tpu as pltpu

_K = 7          # BiasCNN conv kernel size
_P = _K // 2    # conv padding
_C_MID = 4      # hidden conv channels
_CLIP = 8.0
_LN_EPS = 1e-5
_NEG_INF = -1e30


def _gelu_tanh(x):
    # tanh-approximation GELU: most of the cost lands on the otherwise-idle EUP.
    c = 0.7978845608028654  # sqrt(2/pi)
    return 0.5 * x * (1.0 + jnp.tanh(c * (x + 0.044715 * x * x * x)))


# --------------------------------------------------------------------------- #
# In-kernel helpers
# --------------------------------------------------------------------------- #
def _bias_from_cnn(xpad_ref, hpad_ref, S, w1, b1, w2, b2):
    """BiasCNN: Conv2d(1->4,7,pad3) + GELU + Conv2d(4->1,7,pad3), alpha folded
    into (w2, b2) at init, clamp(+-8), zero diagonal.  Returns (S, S) f32 bias.

    xpad_ref : (S+2P, S+2P) VMEM — contact map zero-padded (BOS/EOS + conv pad).
    hpad_ref : (C_MID, S+2P, S+2P) VMEM scratch — zero-bordered hidden planes.
    w1/b1/w2/b2 : Python float tuples (compile-time immediates).
    """
    SP = S + 2 * _P
    xpad = xpad_ref[...]

    # Hoist the 7 lane-direction (dx) slices once; dy variants are sublane slices.
    xcols = [xpad[:, dx:dx + S] for dx in range(_K)]               # each (SP, S)

    # conv1 (1 -> 4): tap-outer / channel-inner -> 49 tap slices, 196 const-FMAs.
    acc = [jnp.full((S, S), b1[c], jnp.float32) for c in range(_C_MID)]
    for dy in range(_K):
        for dx in range(_K):
            tap = xcols[dx][dy:dy + S, :]                          # (S, S)
            for c in range(_C_MID):
                acc[c] = acc[c] + w1[c][dy * _K + dx] * tap

    # conv2 (4 -> 1): all 4 hidden channels written to one zero-bordered padded
    # scratch first (no per-channel store->load chains); only the 3-wide border
    # strips are zeroed (interior is fully overwritten every grid step).
    zrow = jnp.zeros((_C_MID, _P, SP), jnp.float32)
    zcol = jnp.zeros((_C_MID, SP, _P), jnp.float32)
    hpad_ref[:, 0:_P, :] = zrow
    hpad_ref[:, _P + S:SP, :] = zrow
    hpad_ref[:, :, 0:_P] = zcol
    hpad_ref[:, :, _P + S:SP] = zcol
    for c in range(_C_MID):
        hpad_ref[c, _P:_P + S, _P:_P + S] = _gelu_tanh(acc[c])

    # Load each padded plane once, hoist lane-direction slices, then tap FMAs.
    hp = [hpad_ref[c, :, :] for c in range(_C_MID)]                # 4 loads (SP, SP)
    hcols = [[hp[c][:, dx:dx + S] for dx in range(_K)] for c in range(_C_MID)]
    acc2 = jnp.full((S, S), b2, jnp.float32)
    for dy in range(_K):
        for dx in range(_K):
            for c in range(_C_MID):
                acc2 = acc2 + w2[c][dy * _K + dx] * hcols[c][dx][dy:dy + S, :]

    bias = jnp.clip(acc2, -_CLIP, _CLIP)                           # alpha pre-folded
    rows = lax.broadcasted_iota(jnp.int32, (S, S), 0)
    cols = lax.broadcasted_iota(jnp.int32, (S, S), 1)
    return jnp.where(rows == cols, 0.0, bias)                      # bias.fill_diagonal_(0)


def _attention_layernorm(x_ref, w_in_ref, b_in_ref, w_o_ref, b_o_ref,
                         gamma_ref, beta_ref, bias, out_ref, *, heads, head_dim):
    """MultiheadAttention(Q=K=V=x, additive bias) + residual + LayerNorm.

    x_ref    : (S, D) f32
    w_in_ref : (3D, D) f32  — in_proj_weight with 1/sqrt(hd) folded into q rows
    b_in_ref : (3D, 1) f32  — in_proj_bias (q part pre-scaled)
    w_o_ref  : (D, D) f32   — out_proj_weight.T
    b_o/gamma/beta : (1, D) f32
    bias     : (S, S) f32 additive attention bias
    """
    S, D = x_ref.shape
    hd = head_dim
    x = x_ref[...]                                                 # kept for residual

    # Fused QKV projection in the transposed orientation: (3D, D) x (S, D)^T -> (3D, S).
    # Heads now live on the sublane axis -> per-head split is an aligned
    # sublane slice (multiple of hd), no lane relayouts.
    qkv_t = lax.dot_general(w_in_ref[...], x, (((1,), (1,)), ((), ())),
                            preferred_element_type=jnp.float32) + b_in_ref[...]

    ctx_rows = []
    for h in range(heads):
        q_h = qkv_t[h * hd:(h + 1) * hd, :]                        # (hd, S), pre-scaled
        k_h = qkv_t[D + h * hd:D + (h + 1) * hd, :]                # (hd, S)
        v_h = qkv_t[2 * D + h * hd:2 * D + (h + 1) * hd, :]        # (hd, S)

        # scores[i, j] = q_i . k_j  (scale folded into q)   -> (S, S)
        s_h = lax.dot_general(q_h, k_h, (((0,), (0,)), ((), ())),
                              preferred_element_type=jnp.float32) + bias

        # Numerically stable softmax (f32); reciprocal on the EUP slot.
        m = jnp.max(s_h, axis=-1, keepdims=True)
        e = jnp.exp(s_h - m)
        p = e * pl.reciprocal(jnp.sum(e, axis=-1, keepdims=True), approx=True)

        # ctx_t[e, i] = sum_j v[e, j] * p[i, j]              -> (hd, S)
        ctx_rows.append(lax.dot_general(v_h, p, (((1,), (1,)), ((), ())),
                                        preferred_element_type=jnp.float32))

    # Head-major sublane concat -> (D, S); single K=32 out-projection matmul.
    ctx_t = jnp.concatenate(ctx_rows, axis=0)
    attn = lax.dot_general(ctx_t, w_o_ref[...], (((0,), (0,)), ((), ())),
                           preferred_element_type=jnp.float32) + b_o_ref[...]   # (S, D)

    # Residual + LayerNorm (f32).
    y = x + attn
    mu = jnp.mean(y, axis=-1, keepdims=True)
    var = jnp.mean((y - mu) * (y - mu), axis=-1, keepdims=True)
    y_hat = (y - mu) * lax.rsqrt(var + _LN_EPS)
    out_ref[...] = y_hat * gamma_ref[...] + beta_ref[...]


# --------------------------------------------------------------------------- #
# Fused kernels (one pallas_call per forward, grid over batch)
# --------------------------------------------------------------------------- #
def _hard_mask_kernel(cpad_ref, x_ref, w_in_ref, b_in_ref, w_o_ref, b_o_ref,
                      gamma_ref, beta_ref, out_ref, *, heads, head_dim):
    """Hard-mask path: additive -1e30/0 bias built in-kernel from the raw
    zero-padded contact values (border zeros < 0.5 == blocked), diagonal forced
    attendable; then attention + LayerNorm."""
    S = x_ref.shape[0]
    attend = cpad_ref[...] >= 0.5
    rows = lax.broadcasted_iota(jnp.int32, (S, S), 0)
    cols = lax.broadcasted_iota(jnp.int32, (S, S), 1)
    bias = jnp.where(jnp.logical_or(rows == cols, attend), 0.0, _NEG_INF)
    _attention_layernorm(x_ref, w_in_ref, b_in_ref, w_o_ref, b_o_ref, gamma_ref,
                         beta_ref, bias, out_ref, heads=heads, head_dim=head_dim)


def _weighted_mask_kernel(xpad_ref, x_ref, w_in_ref, b_in_ref, w_o_ref, b_o_ref,
                          gamma_ref, beta_ref, out_ref, hpad_ref,
                          *, heads, head_dim, w1, b1, w2, b2):
    """Weighted-mask path: BiasCNN bias computed in VMEM and fed straight into
    attention + LayerNorm (no HBM round trip for the (S, S) bias)."""
    S = x_ref.shape[0]
    bias = _bias_from_cnn(xpad_ref, hpad_ref, S, w1, b1, w2, b2)
    _attention_layernorm(x_ref, w_in_ref, b_in_ref, w_o_ref, b_o_ref, gamma_ref,
                         beta_ref, bias, out_ref, heads=heads, head_dim=head_dim)


# --------------------------------------------------------------------------- #
# Python wrapper
# --------------------------------------------------------------------------- #
class ContactSelfAttentionLayerPallas:
    """JAX/Pallas port of ContactSelfAttentionLayer.

    Accepts a leading batch axis B >= 1 (each sample processed independently,
    equivalent to applying the batch=1 PyTorch module per sample); the batch is
    the pallas grid axis, marked "parallel" for megacore sharding on v7x.
    """

    def __init__(self, dim, heads=4, use_weighted_attn_mask=False,
                 weighted_attn_mask_alpha_init=-4.0, key=None):
        assert dim % heads == 0
        self.dim = dim
        self.heads = heads
        self.head_dim = dim // heads
        self.use_weighted_attn_mask = use_weighted_attn_mask
        if key is None:
            key = jax.random.PRNGKey(1234)
        ks = jax.random.split(key, 8)
        s = 0.02
        # nn.MultiheadAttention(dim, heads, batch_first=True) parameters.
        in_proj_weight = s * jax.random.normal(ks[0], (3 * dim, dim), jnp.float32)
        in_proj_bias = s * jax.random.normal(ks[1], (3 * dim,), jnp.float32)
        out_proj_weight = s * jax.random.normal(ks[2], (dim, dim), jnp.float32)
        out_proj_bias = s * jax.random.normal(ks[3], (dim,), jnp.float32)
        # Fold 1/sqrt(head_dim) into the q rows of the fused in-projection.
        scale = 1.0 / math.sqrt(self.head_dim)
        qscale = jnp.concatenate([jnp.full((dim, 1), scale, jnp.float32),
                                  jnp.ones((2 * dim, 1), jnp.float32)], axis=0)
        self.w_in = (in_proj_weight * qscale).astype(jnp.float32)            # (3D, D)
        self.b_in = (in_proj_bias.reshape(3 * dim, 1) * qscale).astype(jnp.float32)
        self.w_o = out_proj_weight.T.astype(jnp.float32)                     # (D, D)
        self.b_o = out_proj_bias.reshape(1, dim).astype(jnp.float32)         # (1, D)
        # nn.LayerNorm(dim)
        self.ln_gamma = jnp.ones((1, dim), jnp.float32)
        self.ln_beta = jnp.zeros((1, dim), jnp.float32)
        if use_weighted_attn_mask:
            # BiasCNN: Conv2d(1,4,7,pad3) -> GELU -> Conv2d(4,1,7,pad3).
            # Filters are tiny (~200 floats) -> baked into the kernel as
            # compile-time immediates; exp(log_alpha) folded into conv2 weights.
            w1 = 0.05 * jax.random.normal(ks[4], (_C_MID, 1, _K, _K), jnp.float32)
            b1 = 0.05 * jax.random.normal(ks[5], (_C_MID,), jnp.float32)
            w2 = 0.05 * jax.random.normal(ks[6], (1, _C_MID, _K, _K), jnp.float32)
            b2 = 0.05 * jax.random.normal(ks[7], (1,), jnp.float32)
            alpha = math.exp(float(weighted_attn_mask_alpha_init))
            self.conv1_w = tuple(tuple(float(v) for v in w1[c, 0].reshape(-1).tolist())
                                 for c in range(_C_MID))
            self.conv1_b = tuple(float(v) for v in b1.tolist())
            self.conv2_w = tuple(tuple(float(v) * alpha
                                       for v in w2[0, c].reshape(-1).tolist())
                                 for c in range(_C_MID))
            self.conv2_b = float(b2[0]) * alpha

    # ---- shared weight specs (constant index_map -> VMEM-resident over grid) --
    def _weight_args_and_specs(self):
        D = self.dim
        wmap = lambda b: (0, 0)
        args = (self.w_in, self.b_in, self.w_o, self.b_o, self.ln_gamma, self.ln_beta)
        specs = [pl.BlockSpec((3 * D, D), wmap),
                 pl.BlockSpec((3 * D, 1), wmap),
                 pl.BlockSpec((D, D), wmap),
                 pl.BlockSpec((1, D), wmap),
                 pl.BlockSpec((1, D), wmap),
                 pl.BlockSpec((1, D), wmap)]
        return args, specs

    # ---- hard (boolean) attention-mask path ---------------------------------
    def _forward_hard(self, x, cmap):
        B, S, D = x.shape
        # Zero-pad contact probs -> border < 0.5 == blocked (matches F.pad value=True);
        # the -1e30/0 additive bias itself is built in-kernel.
        cpad = jnp.pad(cmap, ((0, 0), (1, 1), (1, 1)))
        bmap = lambda b: (b, 0, 0)
        w_args, w_specs = self._weight_args_and_specs()
        kernel = functools.partial(_hard_mask_kernel, heads=self.heads,
                                   head_dim=self.head_dim)
        return pl.pallas_call(
            kernel,
            grid=(B,),
            out_shape=jax.ShapeDtypeStruct((B, S, D), jnp.float32),
            in_specs=[pl.BlockSpec((None, S, S), bmap),
                      pl.BlockSpec((None, S, D), bmap)] + w_specs,
            out_specs=pl.BlockSpec((None, S, D), bmap),
            compiler_params=pltpu.CompilerParams(
                dimension_semantics=("parallel",)),
        )(cpad, x, *w_args)

    # ---- weighted (BiasCNN) attention-mask path ------------------------------
    def _forward_weighted(self, x, cmap):
        B, S, D = x.shape
        SP = S + 2 * _P
        # Single zero pad combines the BOS/EOS pad (1) and the conv pad (3).
        xpad = jnp.pad(cmap, ((0, 0), (_P + 1, _P + 1), (_P + 1, _P + 1)))
        bmap3 = lambda b: (b, 0, 0)
        bmapS = lambda b: (b, 0, 0)
        w_args, w_specs = self._weight_args_and_specs()
        kernel = functools.partial(_weighted_mask_kernel, heads=self.heads,
                                   head_dim=self.head_dim,
                                   w1=self.conv1_w, b1=self.conv1_b,
                                   w2=self.conv2_w, b2=self.conv2_b)
        return pl.pallas_call(
            kernel,
            grid=(B,),
            out_shape=jax.ShapeDtypeStruct((B, S, D), jnp.float32),
            in_specs=[pl.BlockSpec((None, SP, SP), bmapS),
                      pl.BlockSpec((None, S, D), bmap3)] + w_specs,
            out_specs=pl.BlockSpec((None, S, D), bmap3),
            scratch_shapes=[pltpu.VMEM((_C_MID, SP, SP), jnp.float32)],
            compiler_params=pltpu.CompilerParams(
                dimension_semantics=("parallel",)),
        )(xpad, x, *w_args)

    # ---- forward --------------------------------------------------------------
    def __call__(self, x_tpl, contact_mask):
        # x_tpl: (B, S, D); contact_mask: (B, L, L) with S = L + 2 (B >= 1).
        if contact_mask is None:           # docstring: identity if no contact map
            return x_tpl
        x = x_tpl.astype(jnp.float32)
        cmap = contact_mask.astype(jnp.float32)
        if self.use_weighted_attn_mask:
            return self._forward_weighted(x, cmap)
        return self._forward_hard(x, cmap)


if __name__ == "__main__":
    dim, heads = 32, 4
    L, B = 14, 2
    S = L + 2  # sequence includes BOS/EOS, hence the (1,1,1,1) pad of the contact map

    key = jax.random.PRNGKey(0)
    kx, kc, kp1, kp2 = jax.random.split(key, 4)
    x_tpl = jax.random.normal(kx, (B, S, dim), dtype=jnp.float32)
    cm = jax.random.uniform(kc, (B, L, L), dtype=jnp.float32)
    contact_mask = 0.5 * (cm + jnp.transpose(cm, (0, 2, 1)))   # symmetric "contact probs"

    layer_hard = ContactSelfAttentionLayerPallas(dim, heads, use_weighted_attn_mask=False, key=kp1)
    layer_soft = ContactSelfAttentionLayerPallas(dim, heads, use_weighted_attn_mask=True, key=kp2)

    y_hard = layer_hard(x_tpl, contact_mask)          # batched (grid over B, "parallel")
    y_soft = layer_soft(x_tpl, contact_mask)
    jax.block_until_ready((y_hard, y_soft))

    assert y_hard.shape == (B, S, dim) and y_soft.shape == (B, S, dim)
    assert bool(jnp.all(jnp.isfinite(y_hard))) and bool(jnp.all(jnp.isfinite(y_soft)))
    print("KERNEL_OK")
</pallas_src>

<mosaic_0001>
module attributes {stable_mosaic.version = 11 : i64} {
  func.func @_hard_mask_kernel(%arg0: i32, %arg1: memref<1x16x16xf32, #tpu.memory_space<vmem>>, %arg2: memref<1x16x32xf32, #tpu.memory_space<vmem>>, %arg3: memref<96x32xf32, #tpu.memory_space<vmem>>, %arg4: memref<96x1xf32, #tpu.memory_space<vmem>>, %arg5: memref<32x32xf32, #tpu.memory_space<vmem>>, %arg6: memref<1x32xf32, #tpu.memory_space<vmem>>, %arg7: memref<1x32xf32, #tpu.memory_space<vmem>>, %arg8: memref<1x32xf32, #tpu.memory_space<vmem>>, %arg9: memref<1x16x32xf32, #tpu.memory_space<vmem>>) attributes {dimension_semantics = [#tpu.dimension_semantics<parallel>], iteration_bounds = array<i64: 2>, scalar_prefetch = 0 : i64, scratch_operands = 0 : i64, tpu.core_type = #tpu.core_type<tc>, window_params = [{transform_indices = @transform_0, window_bounds = array<i64: 1, 16, 16>}, {transform_indices = @transform_1, window_bounds = array<i64: 1, 16, 32>}, {pipeline_mode = #tpu.pipeline_mode<synchronous>, transform_indices = @transform_2, window_bounds = array<i64: 96, 32>}, {pipeline_mode = #tpu.pipeline_mode<synchronous>, transform_indices = @transform_3, window_bounds = array<i64: 96, 1>}, {pipeline_mode = #tpu.pipeline_mode<synchronous>, transform_indices = @transform_4, window_bounds = array<i64: 32, 32>}, {pipeline_mode = #tpu.pipeline_mode<synchronous>, transform_indices = @transform_5, window_bounds = array<i64: 1, 32>}, {pipeline_mode = #tpu.pipeline_mode<synchronous>, transform_indices = @transform_6, window_bounds = array<i64: 1, 32>}, {pipeline_mode = #tpu.pipeline_mode<synchronous>, transform_indices = @transform_7, window_bounds = array<i64: 1, 32>}, {transform_indices = @transform_8, window_bounds = array<i64: 1, 16, 32>}]} {
    %c0 = arith.constant 0 : index
    %c0_0 = arith.constant 0 : index
    %c0_1 = arith.constant 0 : index
    %0 = vector.load %arg1[%c0, %c0_0, %c0_1] : memref<1x16x16xf32, #tpu.memory_space<vmem>>, vector<1x16x16xf32>
    %1 = vector.shape_cast %0 : vector<1x16x16xf32> to vector<16x16xf32>
    %cst = arith.constant 5.000000e-01 : f32
    %2 = vector.broadcast %cst : f32 to vector<16x16xf32>
    %3 = arith.cmpf oge, %1, %2 : vector<16x16xf32>
    %4 = tpu.iota {dimensions = array<i32: 0>} : vector<16x16xi32>
    %5 = tpu.iota {dimensions = array<i32: 1>} : vector<16x16xi32>
    %6 = arith.cmpi eq, %4, %5 : vector<16x16xi32>
    %7 = arith.ori %6, %3 : vector<16x16xi1>
    %cst_2 = arith.constant 0.000000e+00 : f32
    %cst_3 = arith.constant -1.000000e+30 : f32
    %8 = vector.broadcast %cst_2 : f32 to vector<16x16xf32>
    %9 = vector.broadcast %cst_3 : f32 to vector<16x16xf32>
    %10 = arith.select %7, %8, %9 : vector<16x16xi1>, vector<16x16xf32>
    %c0_4 = arith.constant 0 : index
    %c0_5 = arith.constant 0 : index
    %c0_6 = arith.constant 0 : index
    %11 = vector.load %arg2[%c0_4, %c0_5, %c0_6] : memref<1x16x32xf32, #tpu.memory_space<vmem>>, vector<1x16x32xf32>
    %12 = vector.shape_cast %11 : vector<1x16x32xf32> to vector<16x32xf32>
    %c0_7 = arith.constant 0 : index
    %c0_8 = arith.constant 0 : index
    %13 = vector.load %arg3[%c0_7, %c0_8] : memref<96x32xf32, #tpu.memory_space<vmem>>, vector<96x32xf32>
    %cst_9 = arith.constant dense<0.000000e+00> : vector<96x16xf32>
    %14 = tpu.matmul %13, %12, %cst_9 {dimension_numbers = #tpu.dot_dimension_numbers<[1], [1], [0], [0], [0, 0, 1, 0], [], []>} : vector<96x32xf32>, vector<16x32xf32>, vector<96x16xf32> -> vector<96x16xf32>
    %c0_10 = arith.constant 0 : index
    %c0_11 = arith.constant 0 : index
    %15 = vector.load %arg4[%c0_10, %c0_11] : memref<96x1xf32, #tpu.memory_space<vmem>>, vector<96x1xf32>
    %16 = vector.broadcast %15 : vector<96x1xf32> to vector<96x16xf32>
    %17 = arith.addf %14, %16 : vector<96x16xf32>
    %18 = vector.extract_strided_slice %17 {offsets = [0, 0], sizes = [8, 16], strides = [1, 1]} : vector<96x16xf32> to vector<8x16xf32>
    %19 = vector.extract_strided_slice %17 {offsets = [32, 0], sizes = [8, 16], strides = [1, 1]} : vector<96x16xf32> to vector<8x16xf32>
    %20 = vector.extract_strided_slice %17 {offsets = [64, 0], sizes = [8, 16], strides = [1, 1]} : vector<96x16xf32> to vector<8x16xf32>
    %cst_12 = arith.constant dense<0.000000e+00> : vector<16x16xf32>
    %21 = tpu.matmul %18, %19, %cst_12 {dimension_numbers = #tpu.dot_dimension_numbers<[0], [0], [1], [1], [0, 1, 1, 1], [], []>} : vector<8x16xf32>, vector<8x16xf32>, vector<16x16xf32> -> vector<16x16xf32>
    %22 = arith.addf %21, %10 : vector<16x16xf32>
    %cst_13 = arith.constant dense<0xFF800000> : vector<16xf32>
    %23 = vector.multi_reduction <maximumf>, %22, %cst_13 [1] : vector<16x16xf32> to vector<16xf32>
    %24 = vector.shape_cast %23 : vector<16xf32> to vector<16x1xf32>
    %25 = vector.broadcast %24 : vector<16x1xf32> to vector<16x16xf32>
    %26 = arith.subf %22, %25 : vector<16x16xf32>
    %27 = math.exp %26 : vector<16x16xf32>
    %cst_14 = arith.constant dense<0.000000e+00> : vector<16xf32>
    %28 = vector.multi_reduction <add>, %27, %cst_14 [1] : vector<16x16xf32> to vector<16xf32>
    %29 = vector.shape_cast %28 : vector<16xf32> to vector<16x1xf32>
    %30 = tpu.reciprocal %29 {approx = true} : vector<16x1xf32> -> vector<16x1xf32>
    %31 = vector.broadcast %30 : vector<16x1xf32> to vector<16x16xf32>
    %32 = arith.mulf %27, %31 : vector<16x16xf32>
    %cst_15 = arith.constant dense<0.000000e+00> : vector<8x16xf32>
    %33 = tpu.matmul %20, %32, %cst_15 {dimension_numbers = #tpu.dot_dimension_numbers<[1], [1], [0], [0], [0, 0, 1, 0], [], []>} : vector<8x16xf32>, vector<16x16xf32>, vector<8x16xf32> -> vector<8x16xf32>
    %34 = vector.extract_strided_slice %17 {offsets = [8, 0], sizes = [8, 16], strides = [1, 1]} : vector<96x16xf32> to vector<8x16xf32>
    %35 = vector.extract_strided_slice %17 {offsets = [40, 0], sizes = [8, 16], strides = [1, 1]} : vector<96x16xf32> to vector<8x16xf32>
    %36 = vector.extract_strided_slice %17 {offsets = [72, 0], sizes = [8, 16], strides = [1, 1]} : vector<96x16xf32> to vector<8x16xf32>
    %cst_16 = arith.constant dense<0.000000e+00> : vector<16x16xf32>
    %37 = tpu.matmul %34, %35, %cst_16 {dimension_numbers = #tpu.dot_dimension_numbers<[0], [0], [1], [1], [0, 1, 1, 1], [], []>} : vector<8x16xf32>, vector<8x16xf32>, vector<16x16xf32> -> vector<16x16xf32>
    %38 = arith.addf %37, %10 : vector<16x16xf32>
    %cst_17 = arith.constant dense<0xFF800000> : vector<16xf32>
    %39 = vector.multi_reduction <maximumf>, %38, %cst_17 [1] : vector<16x16xf32> to vector<16xf32>
    %40 = vector.shape_cast %39 : vector<16xf32> to vector<16x1xf32>
    %41 = vector.broadcast %40 : vector<16x1xf32> to vector<16x16xf32>
    %42 = arith.subf %38, %41 : vector<16x16xf32>
    %43 = math.exp %42 : vector<16x16xf32>
    %cst_18 = arith.constant dense<0.000000e+00> : vector<16xf32>
    %44 = vector.multi_reduction <add>, %43, %cst_18 [1] : vector<16x16xf32> to vector<16xf32>
    %45 = vector.shape_cast %44 : vector<16xf32> to vector<16x1xf32>
    %46 = tpu.reciprocal %45 {approx = true} : vector<16x1xf32> -> vector<16x1xf32>
    %47 = vector.broadcast %46 : vector<16x1xf32> to vector<16x16xf32>
    %48 = arith.mulf %43, %47 : vector<16x16xf32>
    %cst_19 = arith.constant dense<0.000000e+00> : vector<8x16xf32>
    %49 = tpu.matmul %36, %48, %cst_19 {dimension_numbers = #tpu.dot_dimension_numbers<[1], [1], [0], [0], [0, 0, 1, 0], [], []>} : vector<8x16xf32>, vector<16x16xf32>, vector<8x16xf32> -> vector<8x16xf32>
    %50 = vector.extract_strided_slice %17 {offsets = [16, 0], sizes = [8, 16], strides = [1, 1]} : vector<96x16xf32> to vector<8x16xf32>
    %51 = vector.extract_strided_slice %17 {offsets = [48, 0], sizes = [8, 16], strides = [1, 1]} : vector<96x16xf32> to vector<8x16xf32>
    %52 = vector.extract_strided_slice %17 {offsets = [80, 0], sizes = [8, 16], strides = [1, 1]} : vector<96x16xf32> to vector<8x16xf32>
    %cst_20 = arith.constant dense<0.000000e+00> : vector<16x16xf32>
    %53 = tpu.matmul %50, %51, %cst_20 {dimension_numbers = #tpu.dot_dimension_numbers<[0], [0], [1], [1], [0, 1, 1, 1], [], []>} : vector<8x16xf32>, vector<8x16xf32>, vector<16x16xf32> -> vector<16x16xf32>
    %54 = arith.addf %53, %10 : vector<16x16xf32>
    %cst_21 = arith.constant dense<0xFF800000> : vector<16xf32>
    %55 = vector.multi_reduction <maximumf>, %54, %cst_21 [1] : vector<16x16xf32> to vector<16xf32>
    %56 = vector.shape_cast %55 : vector<16xf32> to vector<16x1xf32>
    %57 = vector.broadcast %56 : vector<16x1xf32> to vector<16x16xf32>
    %58 = arith.subf %54, %57 : vector<16x16xf32>
    %59 = math.exp %58 : vector<16x16xf32>
    %cst_22 = arith.constant dense<0.000000e+00> : vector<16xf32>
    %60 = vector.multi_reduction <add>, %59, %cst_22 [1] : vector<16x16xf32> to vector<16xf32>
    %61 = vector.shape_cast %60 : vector<16xf32> to vector<16x1xf32>
    %62 = tpu.reciprocal %61 {approx = true} : vector<16x1xf32> -> vector<16x1xf32>
    %63 = vector.broadcast %62 : vector<16x1xf32> to vector<16x16xf32>
    %64 = arith.mulf %59, %63 : vector<16x16xf32>
    %cst_23 = arith.constant dense<0.000000e+00> : vector<8x16xf32>
    %65 = tpu.matmul %52, %64, %cst_23 {dimension_numbers = #tpu.dot_dimension_numbers<[1], [1], [0], [0], [0, 0, 1, 0], [], []>} : vector<8x16xf32>, vector<16x16xf32>, vector<8x16xf32> -> vector<8x16xf32>
    %66 = vector.extract_strided_slice %17 {offsets = [24, 0], sizes = [8, 16], strides = [1, 1]} : vector<96x16xf32> to vector<8x16xf32>
    %67 = vector.extract_strided_slice %17 {offsets = [56, 0], sizes = [8, 16], strides = [1, 1]} : vector<96x16xf32> to vector<8x16xf32>
    %68 = vector.extract_strided_slice %17 {offsets = [88, 0], sizes = [8, 16], strides = [1, 1]} : vector<96x16xf32> to vector<8x16xf32>
    %cst_24 = arith.constant dense<0.000000e+00> : vector<16x16xf32>
    %69 = tpu.matmul %66, %67, %cst_24 {dimension_numbers = #tpu.dot_dimension_numbers<[0], [0], [1], [1], [0, 1, 1, 1], [], []>} : vector<8x16xf32>, vector<8x16xf32>, vector<16x16xf32> -> vector<16x16xf32>
    %70 = arith.addf %69, %10 : vector<16x16xf32>
    %cst_25 = arith.constant dense<0xFF800000> : vector<16xf32>
    %71 = vector.multi_reduction <maximumf>, %70, %cst_25 [1] : vector<16x16xf32> to vector<16xf32>
    %72 = vector.shape_cast %71 : vector<16xf32> to vector<16x1xf32>
    %73 = vector.broadcast %72 : vector<16x1xf32> to vector<16x16xf32>
    %74 = arith.subf %70, %73 : vector<16x16xf32>
    %75 = math.exp %74 : vector<16x16xf32>
    %cst_26 = arith.constant dense<0.000000e+00> : vector<16xf32>
    %76 = vector.multi_reduction <add>, %75, %cst_26 [1] : vector<16x16xf32> to vector<16xf32>
    %77 = vector.shape_cast %76 : vector<16xf32> to vector<16x1xf32>
    %78 = tpu.reciprocal %77 {approx = true} : vector<16x1xf32> -> vector<16x1xf32>
    %79 = vector.broadcast %78 : vector<16x1xf32> to vector<16x16xf32>
    %80 = arith.mulf %75, %79 : vector<16x16xf32>
    %cst_27 = arith.constant dense<0.000000e+00> : vector<8x16xf32>
    %81 = tpu.matmul %68, %80, %cst_27 {dimension_numbers = #tpu.dot_dimension_numbers<[1], [1], [0], [0], [0, 0, 1, 0], [], []>} : vector<8x16xf32>, vector<16x16xf32>, vector<8x16xf32> -> vector<8x16xf32>
    %82 = tpu.concatenate %33, %49, %65, %81 in 0 : vector<8x16xf32>, vector<8x16xf32>, vector<8x16xf32>, vector<8x16xf32> -> vector<32x16xf32>
    %c0_28 = arith.constant 0 : index
    %c0_29 = arith.constant 0 : index
    %83 = vector.load %arg5[%c0_28, %c0_29] : memref<32x32xf32, #tpu.memory_space<vmem>>, vector<32x32xf32>
    %cst_30 = arith.constant dense<0.000000e+00> : vector<16x32xf32>
    %84 = tpu.matmul %82, %83, %cst_30 {dimension_numbers = #tpu.dot_dimension_numbers<[0], [0], [1], [1], [0, 1, 1, 1], [], []>} : vector<32x16xf32>, vector<32x32xf32>, vector<16x32xf32> -> vector<16x32xf32>
    %c0_31 = arith.constant 0 : index
    %c0_32 = arith.constant 0 : index
    %85 = vector.load %arg6[%c0_31, %c0_32] : memref<1x32xf32, #tpu.memory_space<vmem>>, vector<1x32xf32>
    %86 = vector.broadcast %85 : vector<1x32xf32> to vector<16x32xf32>
    %87 = arith.addf %84, %86 : vector<16x32xf32>
    %88 = arith.addf %12, %87 : vector<16x32xf32>
    %cst_33 = arith.constant dense<0.000000e+00> : vector<16xf32>
    %89 = vector.multi_reduction <add>, %88, %cst_33 [1] : vector<16x32xf32> to vector<16xf32>
    %90 = vector.shape_cast %89 : vector<16xf32> to vector<16x1xf32>
    %cst_34 = arith.constant 3.200000e+01 : f32
    %91 = vector.broadcast %cst_34 : f32 to vector<16x1xf32>
    %92 = arith.divf %90, %91 : vector<16x1xf32>
    %93 = vector.broadcast %92 : vector<16x1xf32> to vector<16x32xf32>
    %94 = arith.subf %88, %93 : vector<16x32xf32>
    %95 = vector.broadcast %92 : vector<16x1xf32> to vector<16x32xf32>
    %96 = arith.subf %88, %95 : vector<16x32xf32>
    %97 = arith.mulf %94, %96 : vector<16x32xf32>
    %cst_35 = arith.constant dense<0.000000e+00> : vector<16xf32>
    %98 = vector.multi_reduction <add>, %97, %cst_35 [1] : vector<16x32xf32> to vector<16xf32>
    %99 = vector.shape_cast %98 : vector<16xf32> to vector<16x1xf32>
    %cst_36 = arith.constant 3.200000e+01 : f32
    %100 = vector.broadcast %cst_36 : f32 to vector<16x1xf32>
    %101 = arith.divf %99, %100 : vector<16x1xf32>
    %102 = vector.broadcast %92 : vector<16x1xf32> to vector<16x32xf32>
    %103 = arith.subf %88, %102 : vector<16x32xf32>
    %cst_37 = arith.constant 9.99999974E-6 : f32
    %104 = vector.broadcast %cst_37 : f32 to vector<16x1xf32>
    %105 = arith.addf %101, %104 : vector<16x1xf32>
    %106 = math.rsqrt %105 : vector<16x1xf32>
    %107 = vector.broadcast %106 : vector<16x1xf32> to vector<16x32xf32>
    %108 = arith.mulf %103, %107 : vector<16x32xf32>
    %c0_38 = arith.constant 0 : index
    %c0_39 = arith.constant 0 : index
    %109 = vector.load %arg7[%c0_38, %c0_39] : memref<1x32xf32, #tpu.memory_space<vmem>>, vector<1x32xf32>
    %110 = vector.broadcast %109 : vector<1x32xf32> to vector<16x32xf32>
    %111 = arith.mulf %108, %110 : vector<16x32xf32>
    %c0_40 = arith.constant 0 : index
    %c0_41 = arith.constant 0 : index
    %112 = vector.load %arg8[%c0_40, %c0_41] : memref<1x32xf32, #tpu.memory_space<vmem>>, vector<1x32xf32>
    %113 = vector.broadcast %112 : vector<1x32xf32> to vector<16x32xf32>
    %114 = arith.addf %111, %113 : vector<16x32xf32>
    %c0_42 = arith.constant 0 : index
    %c0_43 = arith.constant 0 : index
    %c0_44 = arith.constant 0 : index
    %115 = vector.load %arg9[%c0_42, %c0_43, %c0_44] : memref<1x16x32xf32, #tpu.memory_space<vmem>>, vector<1x16x32xf32>
    %116 = vector.shape_cast %115 : vector<1x16x32xf32> to vector<16x32xf32>
    %117 = vector.shape_cast %114 : vector<16x32xf32> to vector<1x16x32xf32>
    tpu.vector_store %arg9[%c0_42, %c0_43, %c0_44], %117 {strides = array<i32>} : memref<1x16x32xf32, #tpu.memory_space<vmem>>, vector<1x16x32xf32>,
    return
  }
  func.func @transform_0(%arg0: i32) -> (i32, i32, i32) {
    %c0_i32 = arith.constant 0 : i32
    %c0_i32_0 = arith.constant 0 : i32
    %c0_i32_1 = arith.constant 0 : i32
    return %arg0, %c0_i32, %c0_i32_0 : i32, i32, i32
  }
  func.func @transform_1(%arg0: i32) -> (i32, i32, i32) {
    %c0_i32 = arith.constant 0 : i32
    %c0_i32_0 = arith.constant 0 : i32
    %c0_i32_1 = arith.constant 0 : i32
    return %arg0, %c0_i32, %c0_i32_0 : i32, i32, i32
  }
  func.func @transform_2(%arg0: i32) -> (i32, i32) {
    %c0_i32 = arith.constant 0 : i32
    %c0_i32_0 = arith.constant 0 : i32
    %c0_i32_1 = arith.constant 0 : i32
    return %c0_i32, %c0_i32_0 : i32, i32
  }
  func.func @transform_3(%arg0: i32) -> (i32, i32) {
    %c0_i32 = arith.constant 0 : i32
    %c0_i32_0 = arith.constant 0 : i32
    %c0_i32_1 = arith.constant 0 : i32
    return %c0_i32, %c0_i32_0 : i32, i32
  }
  func.func @transform_4(%arg0: i32) -> (i32, i32) {
    %c0_i32 = arith.constant 0 : i32
    %c0_i32_0 = arith.constant 0 : i32
    %c0_i32_1 = arith.constant 0 : i32
    return %c0_i32, %c0_i32_0 : i32, i32
  }
  func.func @transform_5(%arg0: i32) -> (i32, i32) {
    %c0_i32 = arith.constant 0 : i32
    %c0_i32_0 = arith.constant 0 : i32
    %c0_i32_1 = arith.constant 0 : i32
    return %c0_i32, %c0_i32_0 : i32, i32
  }
  func.func @transform_6(%arg0: i32) -> (i32, i32) {
    %c0_i32 = arith.constant 0 : i32
    %c0_i32_0 = arith.constant 0 : i32
    %c0_i32_1 = arith.constant 0 : i32
    return %c0_i32, %c0_i32_0 : i32, i32
  }
  func.func @transform_7(%arg0: i32) -> (i32, i32) {
    %c0_i32 = arith.constant 0 : i32
    %c0_i32_0 = arith.constant 0 : i32
    %c0_i32_1 = arith.constant 0 : i32
    return %c0_i32, %c0_i32_0 : i32, i32
  }
  func.func @transform_8(%arg0: i32) -> (i32, i32, i32) {
    %c0_i32 = arith.constant 0 : i32
    %c0_i32_0 = arith.constant 0 : i32
    %c0_i32_1 = arith.constant 0 : i32
    return %arg0, %c0_i32, %c0_i32_0 : i32, i32, i32
  }
}

</mosaic_0001>

<bundles_post_ra>
// kernel: tpu_custom_call.1
= control target key start
LH: loop header
LB: loop body
LE: loop exit
PB: predicated region body
PF: predicated region fallthrough
CT: control target
= control target key end

     0   :  { %13 = vsyncpa [#allocation3], 0  ;;  %s2450_s0 = inlined_call_operand.vmem [shape: f32[2,16,16], index: 0, kind: input, shape index: {}]   ;;  %s2451_s1 = inlined_call_operand.vmem [shape: f32[2,16,32], index: 1, kind: input, shape index: {}]   ;;  %s2452_s2 = inlined_call_operand.vmem [shape: f32[96,32], index: 2, kind: input, shape index: {}]   ;;  %s2453_s3 = inlined_call_operand.vmem [shape: f32[96,1], index: 3, kind: input, shape index: {}]   ;;  %s2454_s4 = inlined_call_operand.vmem [shape: f32[32,32], index: 4, kind: input, shape index: {}]   ;;  %s2455_s5 = inlined_call_operand.vmem [shape: f32[1,32], index: 5, kind: input, shape index: {}]   ;;  %s2456_s6 = inlined_call_operand.vmem [shape: f32[1,32], index: 6, kind: input, shape index: {}]   ;;  %s2457_s7 = inlined_call_operand.vmem [shape: f32[1,32], index: 7, kind: input, shape index: {}]   ;;  %s2458_s8 = inlined_call_operand.hbm [shape: f32[2,16,32], index: 8, kind: output, shape index: {}]  }
   0x1   :  { %15 = vsyncpa [#allocation3 + $0x1], 0  ;;  %s2124_s27 = smov 0   ;;  %s2126_s28 = smov 0  }
   0x2   :  { %s2128_s29 = smov 0   ;;  %s2130_s30 = smov 0  }
   0x3 LB: > { %s2145_s9 = sadd.s32 4294967295, %s2069_s30   ;;  %s1712_s10 = sadd.s32 4294967294, %s2069_s30   ;;  %s2069_s30 = sphi %s2130_s30, %s2466_s30   ;;  %s2065_s29 = sphi %s2128_s29, %s2465_s29   ;;  %s2061_s28 = sphi %s2126_s28, %s2464_s28   ;;  %s2057_s27 = sphi %s2124_s27, %s2463_s27  }
   0x4   : > { %s2149_s11 = sadd.s32 1, %s2069_s30   ;;  %s206_s12 = sadd.s32 1, %s2065_s29 }
   0x5   : > { %s203_s13 = ssub.s32 %s2069_s30, %s2149_s11  ;;  %p216_p0 = scmp.ne.s32.totalorder %s2065_s29, %s2061_s28 }
   0x6   : > { %p204_p1 = scmp.eq.s32.totalorder %s203_s13, 0  ;;  %p217_p2 = scmp.eq.s32.totalorder %s2145_s9, 1 }
   0x7   : > { %p222_p3 = scmp.ne.s32.totalorder %s2061_s28, %s2057_s27  ;;  %p223_p4 = scmp.eq.s32.totalorder %s1712_s10, 1 }
   0x8   : > { %s2160_s14 = scalar_select %p204_p1, %s2065_s29, %s206_s12  }
   0x9   : > { %p2162_p5 = por %p217_p2, %p216_p0  ;;  %p2166_p6 = por %p223_p4, %p222_p3 }
   0xa   : > { %p1715_p7 = scmp.ge.s32.totalorder %s2069_s30, 1  ;;  %p275_p8 = scmp.lt.s32.totalorder %s2069_s30, 3 }
   0xc   : > { %p276_p9 = pnand %p1715_p7, %p275_p8 }
   0xd   : > { %p314_p10 = scmp.lt.s32.totalorder (!%p276_p9), %s2145_s9, 1  ;;  %vm425_vm0 = vcmask (!%p276_p9), 261120   ;;  %v341_v0 = vld [vmem:[%s2452_s2] sm:$0xff] (!%p276_p9)  ;;  %v2071_v1 = vmov (!%p276_p9), 0   ;;  %v342_v7 = vld [vmem:[%s2452_s2 + $0x8] sm:$0xff] (!%p276_p9)  ;;  %v343_v8 = vld [vmem:[%s2452_s2 + $0x10] sm:$0xff] (!%p276_p9)  ;;  %v328_v28 = vlaneseq (!%p276_p9) }
   0xe   : > { %279 = sbr.rel (%p276_p9) target bundleno = 2918 (0xb66), region = 52  ;;  %1816 = vmatprep.mubr.msk.f32.mxu0 (!%p276_p9), %vm425_vm0, %v341_v0  ;;  %1969 = vset.pattern.permute.xlu0 (!%p276_p9), %v2071_v1  ;;  %v353_v2 = vld [vmem:[%s2453_s3] sm:$0xff] (!%p276_p9)  ;;  %vm1894_vm1 = vmpackc.low (!%p276_p9), %vm425_vm0, %vm425_vm0  ;;  %v344_v9 = vld [vmem:[%s2452_s2 + $0x18] sm:$0xff] (!%p276_p9)  ;;  %vm625_vm2 = vcmask (!%p276_p9), 64512   ;;  %v2072_v34 = vmov (!%p276_p9), -1e+30  }
   0xf   : > { %367 = vperm.xlu0 (!%p276_p9), %1969, %v353_v2   ;;  %v357_v3 = vld [vmem:[%s2453_s3 + $0x20] sm:$0xff] (!%p276_p9)  ;;  %v346_v11 = vld [vmem:[%s2452_s2 + $0x28] sm:$0xff] (!%p276_p9)  ;;  %v347_v24 = vld [vmem:[%s2452_s2 + $0x30] sm:$0xff] (!%p276_p9)  ;;  %v329_v29 = vshrl.u32 (!%p276_p9), %v328_v28, 7  ;;  %v332_v31 = vand.u32 (!%p276_p9), 127, %v328_v28  ;;  %vm707_vm9 = vcmask (!%p276_p9), 130048  }
  0x10   : > { %v345_v10 = vld [vmem:[%s2452_s2 + $0x20] sm:$0xff] (!%p276_p9)  ;;  %v348_v25 = vld [vmem:[%s2452_s2 + $0x38] sm:$0xff] (!%p276_p9)  ;;  %v350_v27 = vld [vmem:[%s2452_s2 + $0x48] sm:$0xff] (!%p276_p9)  ;;  %v2073_v60 = vmov (!%p276_p9), 0.0|0.0   ;;  %vm2074_vm10 = vmmov (!%p276_p9), 0   ;;  %v2075_v63 = vmov (!%p276_p9), 0.0  }
  0x11   : > { %v349_v26 = vld [vmem:[%s2452_s2 + $0x40] sm:$0xff] (!%p276_p9)  ;;  %v330_v30 = vadd.s32 (!%p276_p9), 8, %v329_v29  ;;  %vm333_vm6 = vcmp.eq.s32.totalorder (!%p276_p9), %v329_v29, %v332_v31  ;;  %v354_v43 = vld [vmem:[%s2453_s3 + $0x8] sm:$0xff] (!%p276_p9)  ;;  %vm2283_vm11 = vmpackc.low (!%p276_p9), %vm707_vm9, %vm707_vm9  ;;  %s311_s21 = sand.u32 (!%p276_p9), 1, %s2061_s28   ;;  %s2076_s23 = smov (!%p276_p9), [#allocation2]  }
  0x12   : > { %v358_v44 = vld [vmem:[%s2453_s3 + $0x28] sm:$0xff] (!%p276_p9)  ;;  %v361_v57 = vld [vmem:[%s2453_s3 + $0x40] sm:$0xff] (!%p276_p9)  ;;  %v356_v28 = vld [vmem:[%s2453_s3 + $0x18] sm:$0xff] (!%p276_p9)  ;;  %s1716_s25 = sshll.u32 (!%p276_p9), %s311_s21, 4  ;;  %s2409_s20 = scalar_lea.sflag (!%p276_p9), [#allocation3], %s311_s21 }
  0x13   : > { %387 = vperm.xlu0 (!%p276_p9), %1969, %v357_v3   ;;  %vm334_vm4 = vcmp.eq.s32.totalorder (!%p276_p9), %v330_v30, %v332_v31  ;;  %s2011_s24 = sshll.u32 (!%p276_p9), %s2076_s23, 4  ;;  %s2012_s24 = int_to_ptr.vmem [resolvable:$false] %s2011_s24 }
  0x15   : > { %s2178_s19 = scalar_select %p314_p10, %s2145_s9, 1 }
  0x17   : > { %s1765_s22 = sshll.u32 %s2178_s19, 4 }
  0x18   : > { %s323_s10 = scalar_lea.vmem %s2451_s1, %s1765_s22  ;;  %s318_s26 = scalar_lea.vmem %s2450_s0, %s1765_s22 }
  0x19   : > { %v2192_v4 = vld [vmem:[%s323_s10] sm:$0xff]  ;;  %v2194_v5 = vld [vmem:[%s323_s10 + $0x8] sm:$0xff]  ;;  %s1767_s22 = sshll.u32 %s2145_s9, 8  ;;  %s313_s10 = scalar_lea.vmem [#allocation2], %s1716_s25 }
  0x1a   : > { %v1893_v6 = vpack.c.bf16 %v2194_v5, %v2192_v4  ;;  %v325_v32 = vld [vmem:[%s318_s26 + $0x8] sm:$0xff]  ;;  %v324_v33 = vld [vmem:[%s318_s26] sm:$0xff]  ;;  %s1638_s12 = sshll.u32 %s313_s10, 4  ;;  %s2404_s18 = scalar_lea.hbm %s2458_s8, %s1767_s22  ;;  %s2406_s12 = int_to_ptr.vmem [resolvable:$true] %s1638_s12 }
  0x1b   : > { %vm327_vm3 = vcmp.ge.f32.partialorder %v325_v32, 0.5  ;;  %vm326_vm5 = vcmp.ge.f32.partialorder %v324_v33, 0.5  ;;  %s2007_s9 = scalar_lea.vmem %s2406_s12, 256  ;;  %s2013_s25 = scalar_lea.vmem %s2012_s24, 512 }
  0x1c   : > { %1895 = vmatprep.subr.msk.bf16.mxu0 %vm1894_vm1, %v1893_v6  ;;  %vm336_vm7 = vmor %vm334_vm4, %vm327_vm3  ;;  %p2008_p11 = scmp.ne.s32.totalorder %s2406_s12, %s2007_s9  ;;  %p2014_p0 = scmp.lt.s32.totalorder %s2406_s12, %s2012_s24 }
  0x1d   : > { %1898 = vmatpush3.bf16.xpose.msk.msra.mxu0 %vm1894_vm1, %v1893_v6  ;;  %vm335_vm8 = vmor %vm333_vm6, %vm326_vm5  ;;  %v2251_v35 = vsel %vm336_vm7, 0.0, %v2072_v34  ;;  %p2015_p1 = scmp.lt.s32.totalorder %s2013_s25, %s2007_s9 }
  0x1e   : > { %v2253_v36 = vsel %vm335_vm8, 0.0, %v2072_v34  ;;  %1907 = vmatprep.subr.bf16.mxu0 %v2073_v60  ;;  %p2009_p12 = pnand %p2008_p11, %p2162_p5 }
  0x1f   : > { %p2016_p2 = por %p2015_p1, %p2014_p0 }
  0x20   : > { %p2010_p13 = pneg %p2009_p12 }
  0x22   : > { %p2017_p3 = pnand %p2016_p2, %p2010_p13 }
  0x24   : > { %1817 = vmatmul.mubr.msk.f32.vlgmr.msra.gmra.mrb[0].mxu0 %vm425_vm0, %v342_v7 }
  0x25   : > { %1819 = vmatprep.mubr.msk.f32.mxu0 %vm425_vm0, %v343_v8 }
  0x28   : > { %1820 = vmatmul.mubr.msk.f32.gmra.mrb[2].mxu0 %vm425_vm0, %v344_v9  ;;  %v1453_v9 = vld [vmem:[%s2454_s4 + $0x10] sm:$0xff] }
  0x29   : > { %1822 = vmatprep.mubr.msk.f32.mxu0 %vm425_vm0, %v345_v10 }
  0x2c   : > { %1823 = vmatmul.mubr.msk.f32.gmra.mrb[4].mxu0 %vm425_vm0, %v346_v11 }
  0x2d   : > { %1825 = vmatprep.mubr.msk.f32.mxu0 %vm425_vm0, %v347_v24 }
  0x30   : > { %1826 = vmatmul.mubr.msk.f32.gmra.mrb[6].mxu0 %vm425_vm0, %v348_v25 }
  0x31   : > { %1828 = vmatprep.mubr.msk.f32.mxu0 %vm425_vm0, %v349_v26  ;;  %v355_v26 = vld [vmem:[%s2453_s3 + $0x10] sm:$0xff] }
  0x34   : > { %1829 = vmatmul.mubr.msk.f32.gmra.mrb[8].mxu0 %vm425_vm0, %v350_v27  ;;  %v362_v27 = vld [vmem:[%s2453_s3 + $0x48] sm:$0xff] }
  0x8e   : > { %v368_v13 = vpop.permute.xlu0 %367 }
  0x92   : > { %v388_v19 = vpop.permute.xlu0 %387 }
  0xf7   : > { %v2220_v12 = vpop.f32.mrb[0].mxu0 }
  0xf8   : > { %v534_v14 = vpop.f32.mrb[1].mxu0 }
  0xf9   : > { %v535_v15 = vadd.f32 %v534_v14, %v368_v13 }
  0xfb   : > { %593 = vxpose.xlu1.b32.start.end [1/1] (short) (narrow) %v535_v15, 16  ;;  %v2222_v16 = vpop.f32.mrb[2].mxu0 }
  0xfc   : > { %v2224_v17 = vpop.f32.mrb[3].mxu0 }
  0xff   : > { %v2226_v18 = vpop.f32.mrb[4].mxu0 }
 0x100   : > { %v554_v20 = vpop.f32.mrb[5].mxu0 }
 0x101   : > { %v555_v21 = vadd.f32 %v554_v20, %v388_v19 }
 0x103   : > { %1834 = vmatprep.subr.mxu1 %v555_v21  ;;  %v2271_v58 = vpop.f32.mrb[6].mxu0 }
 0x104   : > { %1835 = vmatpush3.msra.mxu1 %v555_v21  ;;  %v2273_v59 = vpop.f32.mrb[7].mxu0 }
 0x105   : > { %1899 = vmatprep.subr.bf16.mxu1 %v2073_v60 }
 0x107   : > { %v2277_v61 = vpop.f32.mrb[8].mxu0 }
 0x108   : > { %v574_v62 = vpop.f32.mrb[9].mxu0 }
 0x119   : > { %1970 = vset.pattern.permute.xlu1 %v2071_v1 }
 0x17b   : > { %v609_v22 = vpop.trf.xlu1 }
 0x17c   : > { %1836 = vmatprep.mubr.msk.f32.mxu1 %vm625_vm2, %v609_v22 }
 0x17f   : > { %v610_v23 = vpop.trf.xlu1 }
 0x180   : > { %1837 = vmatmul.mubr.msk.f32.vlgmr.msra.gmra.mrb[0].mxu1 %vm625_vm2, %v610_v23 }
 0x181   : > { %1843 = vmatprep.mubr.msk.f32.mxu1 %vm2074_vm10, %v2075_v63 }
 0x253   : > { %v1838_v37 = vpop.f32.mrb[0].mxu1 }
 0x254   : > { %v704_v38 = vadd.f32 %v1838_v37, %v2251_v35  ;;  %v698_v39 = vpop.f32.mrb[1].mxu1 }
 0x255   : > { %v699_v40 = vadd.f32 %v698_v39, %v2253_v36 }
 0x256   : > { %v711_v41 = vsel %vm707_vm9, %v704_v38, -inf }
 0x257   : > { %712 = vmax.xlane.f32.xlu0 %v711_v41  ;;  %v708_v42 = vsel %vm707_vm9, %v699_v40, -inf  ;;  %v359_v41 = vld [vmem:[%s2453_s3 + $0x30] sm:$0xff] }
 0x258   : > { %709 = vmax.xlane.f32.xlu1 %v708_v42  ;;  %v360_v42 = vld [vmem:[%s2453_s3 + $0x38] sm:$0xff] }
 0x26d   : > { %372 = vperm.xlu0 %1969, %v354_v43  }
 0x271   : > { %392 = vperm.xlu0 %1969, %v358_v44  }
 0x2e4   : > { %v713_v45 = vpop.xlane.xlu0 %712 }
 0x2e5   : > { %v715_v46 = vsub.f32 %v704_v38, %v713_v45  ;;  %v710_v47 = vpop.xlane.xlu1 %709 }
 0x2e6   : > { %v714_v48 = vsub.f32 %v699_v40, %v710_v47 }
 0x2e7   : > { %v718_v49 = vmul.f32 1.442695, %v715_v46 }
 0x2e8   : > { %v716_v50 = vmul.f32 1.442695, %v714_v48 }
 0x2e9   : > { %1971 = vpow2.f32 %v718_v49 }
 0x2ea   : > { %1973 = vpow2.f32 %v716_v50 }
 0x2ec   : > { %v373_v51 = vpop.permute.xlu0 %372 }
 0x2ed   : > { %v540_v52 = vadd.f32 %v2220_v12, %v373_v51 }
 0x2ef   : > { %809 = vxpose.xlu0.b32.start.end [1/1] (short) (narrow) %v540_v52, 16 }
 0x2f0   : > { %v393_v6 = vpop.permute.xlu0 %392 }
 0x2f1   : > { %v560_v11 = vadd.f32 %v2226_v18, %v393_v6 }
 0x2f3   : > { %v1972_v53 = vpop.eup %1971 }
 0x2f4   : > { %v723_v54 = vsel %vm707_vm9, %v1972_v53, 0.0  ;;  %v1974_v55 = vpop.eup %1973 }
 0x2f5   : > { %724 = vadd.xlane.f32.xlu1 %v723_v54  ;;  %v720_v56 = vsel %vm707_vm9, %v1974_v55, 0.0 }
 0x2f9   : > { %721 = vadd.xlane.f32.xlu1 %v720_v56 }
 0x30a   : > { %407 = vperm.xlu1 %1970, %v361_v57  }
 0x36f   : > { %v825_v13 = vpop.trf.xlu0 }
 0x373   : > { %v826_v15 = vpop.trf.xlu0 }
 0x382   : > { %v725_v0 = vpop.xlane.xlu1 %724 }
 0x383   : > { %1975 = vrcp.f32 %v725_v0 }
 0x386   : > { %v722_v1 = vpop.xlane.xlu1 %721 }
 0x387   : > { %1977 = vrcp.f32 %v722_v1 }
 0x38a   : > { %v408_v12 = vpop.permute.xlu1 %407 }
 0x38b   : > { %v575_v14 = vadd.f32 %v574_v62, %v408_v12 }
 0x38d   : > { %v1976_v2 = vpop.eup %1975 }
 0x38e   : > { %v729_v7 = vmul.f32 %v1976_v2, %v1972_v53 }
 0x391   : > { %v1978_v3 = vpop.eup %1977 }
 0x392   : > { %v728_v8 = vmul.f32 %v1978_v3, %v1974_v55 }
 0x394   : > { %v1900_v10 = vpack.c.bf16 %v729_v7, %v728_v8 }
 0x396   : > { %1902 = vmatpush3.bf16.xpose.msk.msra.mxu1 %vm2283_vm11, %v1900_v10 }
 0x397   : > { %1846 = vmatprep.subr.mxu1 %v560_v11 }
 0x39d   : > { %1844 = vmatmul.mubr.msk.f32.vlgmr.msra.gmra.mrb[2].mxu1 %vm707_vm9, %v575_v14 }
 0x39e   : > { %1847 = vmatpush3.msra.mxu1 %v560_v11  ;;  %1848 = vmatprep.mubr.msk.f32.mxu1 %vm625_vm2, %v825_v13 }
 0x39f   : > { %1903 = vmatprep.subr.bf16.mxu1 %v2073_v60 }
 0x3a1   : > { %1849 = vmatmul.mubr.msk.f32.vlgmr.msra.gmra.mrb[4].mxu1 %vm625_vm2, %v826_v15 }
 0x3a2   : > { %1855 = vmatprep.mubr.msk.f32.mxu1 %vm2074_vm10, %v2075_v63 }
 0x470   : > { %v2296_v18 = vpop.f32.mrb[2].mxu1 }
 0x471   : > { %v1845_v19 = vpop.f32.mrb[3].mxu1 }
 0x474   : > { %v1850_v20 = vpop.f32.mrb[4].mxu1 }
 0x475   : > { %v919_v21 = vadd.f32 %v1850_v20, %v2251_v35  ;;  %v913_v22 = vpop.f32.mrb[5].mxu1 }
 0x476   : > { %v914_v23 = vadd.f32 %v913_v22, %v2253_v36 }
 0x477   : > { %v925_v24 = vsel %vm707_vm9, %v919_v21, -inf }
 0x478   : > { %926 = vmax.xlane.f32.xlu0 %v925_v24  ;;  %v922_v25 = vsel %vm707_vm9, %v914_v23, -inf }
 0x479   : > { %923 = vmax.xlane.f32.xlu1 %v922_v25 }
 0x48a   : > { %377 = vperm.xlu1 %1970, %v355_v26  }
 0x48e   : > { %412 = vperm.xlu0 %1969, %v362_v27   ;;  %382 = vperm.xlu1 %1970, %v356_v28  }
 0x505   : > { %v927_v29 = vpop.xlane.xlu0 %926 }
 0x506   : > { %v929_v30 = vsub.f32 %v919_v21, %v927_v29  ;;  %v924_v31 = vpop.xlane.xlu1 %923 }
 0x507   : > { %v928_v32 = vsub.f32 %v914_v23, %v924_v31 }
 0x508   : > { %v932_v33 = vmul.f32 1.442695, %v929_v30 }
 0x509   : > { %v930_v34 = vmul.f32 1.442695, %v928_v32 }
 0x50a   : > { %1979 = vpow2.f32 %v932_v33  ;;  %v378_v43 = vpop.permute.xlu1 %377 }
 0x50b   : > { %1981 = vpow2.f32 %v930_v34  ;;  %v545_v44 = vadd.f32 %v2224_v17, %v378_v43  ;;  %v364_v43 = vld [vmem:[%s2453_s3 + $0x58] sm:$0xff] }
 0x50d   : > { %v413_v47 = vpop.permute.xlu0 %412 }
 0x50e   : > { %v383_v45 = vpop.permute.xlu1 %382 }
 0x50f   : > { %v550_v46 = vadd.f32 %v2222_v16, %v383_v45  ;;  %v580_v16 = vadd.f32 %v2277_v61, %v413_v47  ;;  %v352_v61 = vld [vmem:[%s2452_s2 + $0x58] sm:$0xff] }
 0x514   : > { %v1980_v37 = vpop.eup %1979 }
 0x515   : > { %v1982_v38 = vpop.eup %1981  ;;  %v937_v39 = vsel %vm707_vm9, %v1980_v37, 0.0 }
 0x516   : > { %938 = vadd.xlane.f32.xlu0 %v937_v39  ;;  %v934_v40 = vsel %vm707_vm9, %v1982_v38, 0.0 }
 0x517   : > { %935 = vadd.xlane.f32.xlu1 %v934_v40  ;;  %v363_v40 = vld [vmem:[%s2453_s3 + $0x50] sm:$0xff] }
 0x528   : > { %397 = vperm.xlu1 %1970, %v359_v41  }
 0x52c   : > { %402 = vperm.xlu0 %1969, %v360_v42  }
 0x54a   : > { %1023 = vxpose.xlu0.b32.start.end [1/1] (short) (narrow) %v545_v44, 16 }
 0x551   : > { %1237 = vxpose.xlu1.b32.start.end [1/1] (short) (narrow) %v550_v46, 16 }
 0x5a3   : > { %v939_v48 = vpop.xlane.xlu0 %938 }
 0x5a4   : > { %1983 = vrcp.f32 %v939_v48  ;;  %v936_v49 = vpop.xlane.xlu1 %935 }
 0x5a5   : > { %1985 = vrcp.f32 %v936_v49 }
 0x5a8   : > { %v398_v54 = vpop.permute.xlu1 %397 }
 0x5a9   : > { %v565_v56 = vadd.f32 %v2273_v59, %v398_v54 }
 0x5ab   : > { %v403_v17 = vpop.permute.xlu0 %402 }
 0x5ac   : > { %v570_v57 = vadd.f32 %v2271_v58, %v403_v17  ;;  %v351_v58 = vld [vmem:[%s2452_s2 + $0x50] sm:$0xff] }
 0x5ad   : > { %1831 = vmatprep.mubr.msk.f32.mxu0 %vm425_vm0, %v351_v58  ;;  %v1454_v58 = vld [vmem:[%s2454_s4 + $0x18] sm:$0xff] }
 0x5ae   : > { %v1984_v50 = vpop.eup %1983  ;;  %1832 = vmatmul.mubr.msk.f32.gmra.mrb[10].mxu0 %vm425_vm0, %v352_v61  ;;  %v1919_v61 = vpack.c.bf16 %v1454_v58, %v1453_v9 }
 0x5af   : > { %v1986_v51 = vpop.eup %1985  ;;  %v943_v52 = vmul.f32 %v1984_v50, %v1980_v37  ;;  %1867 = vmatprep.mubr.msk.f32.mxu0 %vm2074_vm10, %v2075_v63 }
 0x5b0   : > { %v942_v53 = vmul.f32 %v1986_v51, %v1982_v38 }
 0x5b2   : > { %v1904_v55 = vpack.c.bf16 %v943_v52, %v942_v53 }
 0x5b4   : > { %1906 = vmatpush3.bf16.xpose.msk.msra.mxu1 %vm2283_vm11, %v1904_v55 }
 0x5b5   : > { %1858 = vmatprep.subr.mxu1 %v565_v56 }
 0x5bb   : > { %1856 = vmatmul.mubr.msk.f32.vlgmr.msra.gmra.mrb[6].mxu1 %vm707_vm9, %v580_v16 }
 0x5bc   : > { %1859 = vmatpush3.msra.mxu1 %v565_v56 }
 0x5bd   : > { %1870 = vmatprep.subr.mxu1 %v570_v57 }
 0x5ca   : > { %v1039_v62 = vpop.trf.xlu0 }
 0x5cb   : > { %1860 = vmatprep.mubr.msk.f32.mxu1 %vm625_vm2, %v1039_v62 }
 0x5ce   : > { %v1040_v0 = vpop.trf.xlu0 }
 0x5cf   : > { %1861 = vmatmul.mubr.msk.f32.vlgmr.msra.gmra.mrb[8].mxu1 %vm625_vm2, %v1040_v0  ;;  %v1451_v0 = vld [vmem:[%s2454_s4] sm:$0xff] }
 0x5d0   : > { %1871 = vmatpush3.msra.mxu1 %v570_v57 }
 0x5d1   : > { %v1253_v59 = vpop.trf.xlu1  ;;  %1911 = vmatprep.subr.bf16.mxu1 %v2073_v60 }
 0x5d2   : > { %1872 = vmatprep.mubr.msk.f32.mxu1 %vm625_vm2, %v1253_v59  ;;  %v1452_v59 = vld [vmem:[%s2454_s4 + $0x8] sm:$0xff] }
 0x5d5   : > { %v1254_v1 = vpop.trf.xlu1 }
 0x5d6   : > { %1873 = vmatmul.mubr.msk.f32.vlgmr.msra.gmra.mrb[10].mxu1 %vm625_vm2, %v1254_v1  ;;  %v1915_v1 = vpack.c.bf16 %v1452_v59, %v1451_v0 }
 0x5d7   : > { %1879 = vmatprep.mubr.msk.f32.mxu1 %vm2074_vm10, %v2075_v63 }
 0x681   : > { %v1833_v41 = vpop.f32.mrb[10].mxu0 }
 0x682   : > { %v584_v42 = vpop.f32.mrb[11].mxu0 }
 0x68e   : > { %v1019_v60 = vpop.f32.mrb[6].mxu1 }
 0x68f   : > { %v1857_v2 = vpop.f32.mrb[7].mxu1 }
 0x6a2   : > { %v1862_v3 = vpop.f32.mrb[8].mxu1 }
 0x6a3   : > { %v1133_v6 = vadd.f32 %v1862_v3, %v2251_v35  ;;  %v1127_v7 = vpop.f32.mrb[9].mxu1 }
 0x6a4   : > { %v1128_v8 = vadd.f32 %v1127_v7, %v2253_v36 }
 0x6a5   : > { %v1139_v10 = vsel %vm707_vm9, %v1133_v6, -inf }
 0x6a6   : > { %1140 = vmax.xlane.f32.xlu1 %v1139_v10  ;;  %v1136_v11 = vsel %vm707_vm9, %v1128_v8, -inf  ;;  %v1755_v10 = vld [vmem:[%s2455_s5] ss:$0 sm:$0xff] }
 0x6a7   : > { %1137 = vmax.xlane.f32.xlu0 %v1136_v11 }
 0x6a9   : > { %v1874_v12 = vpop.f32.mrb[10].mxu1 }
 0x6aa   : > { %v1341_v13 = vpop.f32.mrb[11].mxu1  ;;  %v1347_v63 = vadd.f32 %v1874_v12, %v2251_v35 }
 0x6ab   : > { %v1342_v14 = vadd.f32 %v1341_v13, %v2253_v36 }
 0x6ac   : > { %v1353_v19 = vsel %vm707_vm9, %v1347_v63, -inf }
 0x6ad   : > { %v1350_v15 = vsel %vm707_vm9, %v1342_v14, -inf }
 0x6ae   : > { %1351 = vmax.xlane.f32.xlu0 %v1350_v15 }
 0x6b2   : > { %1354 = vmax.xlane.f32.xlu0 %v1353_v19 }
 0x733   : > { %v1141_v20 = vpop.xlane.xlu1 %1140 }
 0x734   : > { %v1143_v21 = vsub.f32 %v1133_v6, %v1141_v20  ;;  %v1138_v22 = vpop.xlane.xlu0 %1137 }
 0x735   : > { %v1142_v23 = vsub.f32 %v1128_v8, %v1138_v22 }
 0x736   : > { %v1146_v24 = vmul.f32 1.442695, %v1143_v21 }
 0x737   : > { %v1144_v25 = vmul.f32 1.442695, %v1142_v23 }
 0x738   : > { %1987 = vpow2.f32 %v1146_v24 }
 0x739   : > { %1989 = vpow2.f32 %v1144_v25 }
 0x73b   : > { %v1352_v26 = vpop.xlane.xlu0 %1351 }
 0x73c   : > { %v1356_v27 = vsub.f32 %v1342_v14, %v1352_v26 }
 0x73e   : > { %v1358_v28 = vmul.f32 1.442695, %v1356_v27 }
 0x73f   : > { %v1355_v36 = vpop.xlane.xlu0 %1354 }
 0x740   : > { %1991 = vpow2.f32 %v1358_v28  ;;  %v1357_v35 = vsub.f32 %v1347_v63, %v1355_v36 }
 0x742   : > { %v1988_v29 = vpop.eup %1987  ;;  %v1360_v30 = vmul.f32 1.442695, %v1357_v35 }
 0x743   : > { %v1151_v31 = vsel %vm707_vm9, %v1988_v29, 0.0  ;;  %v1990_v32 = vpop.eup %1989 }
 0x744   : > { %1993 = vpow2.f32 %v1360_v30  ;;  %1152 = vadd.xlane.f32.xlu0 %v1151_v31  ;;  %v1148_v33 = vsel %vm707_vm9, %v1990_v32, 0.0 }
 0x748   : > { %1149 = vadd.xlane.f32.xlu0 %v1148_v33 }
 0x74a   : > { %v1992_v34 = vpop.eup %1991 }
 0x74b   : > { %v1362_v37 = vsel %vm707_vm9, %v1992_v34, 0.0 }
 0x74c   : > { %1363 = vadd.xlane.f32.xlu1 %v1362_v37 }
 0x74e   : > { %v1994_v38 = vpop.eup %1993 }
 0x74f   : > { %v1365_v39 = vsel %vm707_vm9, %v1994_v38, 0.0 }
 0x750   : > { %1366 = vadd.xlane.f32.xlu0 %v1365_v39 }
 0x75d   : > { %417 = vperm.xlu1 %1970, %v363_v40  }
 0x766   : > { %422 = vperm.xlu0 %1969, %v364_v43  }
 0x786   : > { %1462 = vxpose.xlu1.b32.start [1/4] (short) (narrow) %v2296_v18, 16 }
 0x78a   : > { %1463 = vxpose.xlu1.b32.cont [2/4] (short) (narrow) %v1019_v60, 16 }
 0x7d1   : > { %v1153_v44 = vpop.xlane.xlu0 %1152 }
 0x7d2   : > { %1995 = vrcp.f32 %v1153_v44 }
 0x7d5   : > { %v1150_v45 = vpop.xlane.xlu0 %1149 }
 0x7d6   : > { %1997 = vrcp.f32 %v1150_v45 }
 0x7d9   : > { %v1364_v46 = vpop.xlane.xlu1 %1363 }
 0x7da   : > { %1999 = vrcp.f32 %v1364_v46 }
 0x7dc   : > { %v1996_v48 = vpop.eup %1995 }
 0x7dd   : > { %v1367_v47 = vpop.xlane.xlu0 %1366  ;;  %v1157_v50 = vmul.f32 %v1996_v48, %v1988_v29  ;;  %v418_v54 = vpop.permute.xlu1 %417 }
 0x7de   : > { %2001 = vrcp.f32 %v1367_v47  ;;  %v585_v17 = vadd.f32 %v584_v42, %v418_v54 }
 0x7e0   : > { %v1998_v49 = vpop.eup %1997 }
 0x7e1   : > { %v1156_v51 = vmul.f32 %v1998_v49, %v1990_v32 }
 0x7e3   : > { %v1908_v52 = vpack.c.bf16 %v1157_v50, %v1156_v51 }
 0x7e4   : > { %v2000_v53 = vpop.eup %1999 }
 0x7e5   : > { %1910 = vmatpush3.bf16.xpose.msk.msra.mxu0 %vm2283_vm11, %v1908_v52  ;;  %v1370_v55 = vmul.f32 %v2000_v53, %v1992_v34  ;;  %v423_v57 = vpop.permute.xlu0 %422  ;;  %v1758_v34 = vld [vmem:[%s2456_s6] ss:$0 sm:$0xff] }
 0x7e6   : > { %v590_v62 = vadd.f32 %v1833_v41, %v423_v57  ;;  %1916 = vmatprep.subr.bf16.mxu0 %v1915_v1 }
 0x7e8   : > { %v2002_v18 = vpop.eup %2001 }
 0x7e9   : > { %v1371_v56 = vmul.f32 %v2002_v18, %v1994_v38  ;;  %v1759_v38 = vld [vmem:[%s2457_s7] ss:$0 sm:$0xff] }
 0x7eb   : > { %v1912_v16 = vpack.c.bf16 %v1371_v56, %v1370_v55 }
 0x7ec   : > { %1868 = vmatmul.mubr.msk.f32.vlgmr.msra.gmra.mrb[12].mxu0 %vm707_vm9, %v585_v17 }
 0x7ed   : > { %1914 = vmatpush3.bf16.xpose.msk.msra.mxu1 %vm2283_vm11, %v1912_v16  ;;  %1918 = vmatpush3.bf16.msra.mxu0 %v1915_v1 }
 0x7ee   : > { %1920 = vmatprep.subr.bf16.mxu0 %v1919_v61 }
 0x7f1   : > { %1922 = vmatpush3.bf16.msra.mxu0 %v1919_v61 }
 0x7f4   : > { %1880 = vmatmul.mubr.msk.f32.vlgmr.msra.gmra.mrb[12].mxu1 %vm707_vm9, %v590_v62 }
 0x8bf   : > { %v1233_v60 = vpop.f32.mrb[12].mxu0 }
 0x8c0   : > { %1464 = vxpose.xlu1.b32.cont [3/4] (short) (narrow) %v1233_v60, 16  ;;  %v1869_v2 = vpop.f32.mrb[13].mxu0 }
 0x8c7   : > { %v1447_v3 = vpop.f32.mrb[12].mxu1 }
 0x8c8   : > { %v1881_v6 = vpop.f32.mrb[13].mxu1  ;;  %1465 = vxpose.xlu1.b32.end [4/4] (short) (narrow) %v1447_v3, 16 }
 0x93c   : > { %v1478_v7 = vpop.trf.xlu1 }
 0x93d   : > { %1890 = vmatprep.mubr.msk.f32.mxu0 %vm425_vm0, %v1478_v7 }
 0x940   : > { %v1479_v8 = vpop.trf.xlu1 }
 0x941   : > { %1891 = vmatmul.mubr.msk.f32.vlgmr.msra.gmra.mrb[14].mxu0 %vm425_vm0, %v1479_v8 }
 0xa14   : > { %v1892_v11 = vpop.f32.mrb[14].mxu0 }
 0xa15   : > { %v1566_v12 = vpop.f32.mrb[15].mxu0  ;;  %v1572_v13 = vadd.f32 %v1892_v11, %v1755_v10 }
 0xa16   : > { %v1567_v14 = vadd.f32 %v1755_v10, %v1566_v12 }
 0xa17   : > { %v1576_v19 = vadd.f32 %v1572_v13, %v2194_v5 }
 0xa18   : > { %v1575_v63 = vadd.f32 %v1567_v14, %v2192_v4 }
 0xa19   : > { %v1580_v20 = vsel %vm425_vm0, %v1576_v19, 0.0 }
 0xa1a   : > { %v1577_v15 = vsel %vm425_vm0, %v1575_v63, 0.0 }
 0xa1b   : > { %1578 = vadd.xlane.f32.xlu0 %v1577_v15 }
 0xa1f   : > { %1581 = vadd.xlane.f32.xlu0 %v1580_v20 }
 0xaa8   : > { %v1579_v21 = vpop.xlane.xlu0 %1578 }
 0xaa9   : > { %v1584_v22 = vmul.f32 0.03125, %v1579_v21 }
 0xaab   : > { %v1586_v23 = vsub.f32 %v1575_v63, %v1584_v22 }
 0xaac   : > { %v1582_v24 = vpop.xlane.xlu0 %1581 }
 0xaad   : > { %v1585_v25 = vmul.f32 0.03125, %v1582_v24  ;;  %v1588_v26 = vmul.f32 %v1586_v23, %v1586_v23 }
 0xaaf   : > { %v1587_v27 = vsub.f32 %v1576_v19, %v1585_v25  ;;  %v1590_v28 = vsel %vm425_vm0, %v1588_v26, 0.0 }
 0xab0   : > { %1591 = vadd.xlane.f32.xlu0 %v1590_v28 }
 0xab1   : > { %v1589_v4 = vmul.f32 %v1587_v27, %v1587_v27 }
 0xab3   : > { %v1593_v36 = vsel %vm425_vm0, %v1589_v4, 0.0 }
 0xab4   : > { %1594 = vadd.xlane.f32.xlu0 %v1593_v36 }
 0xb3d   : > { %v1592_v5 = vpop.xlane.xlu0 %1591 }
 0xb3e   : > { %v1596_v35 = vmul.f32 0.03125, %v1592_v5 }
 0xb40   : > { %v1598_v29 = vadd.f32 1e-05, %v1596_v35 }
 0xb41   : > { %v1595_v30 = vpop.xlane.xlu0 %1594 }
 0xb42   : > { %2003 = vrsqrt.f32 %v1598_v29  ;;  %v1597_v31 = vmul.f32 0.03125, %v1595_v30 }
 0xb44   : > { %v1599_v32 = vadd.f32 1e-05, %v1597_v31 }
 0xb46   : > { %2005 = vrsqrt.f32 %v1599_v32 }
 0xb4c   : > { %v2004_v33 = vpop.eup %2003 }
 0xb4d   : > { %v1602_v37 = vmul.f32 %v2004_v33, %v1586_v23 }
 0xb4f   : > { %v1611_v39 = vmul.f32 %v1758_v34, %v1602_v37 }
 0xb50   : > { %v2006_v40 = vpop.eup %2005 }
 0xb51   : > { %v1603_v41 = vmul.f32 %v2006_v40, %v1587_v27  ;;  %v1620_v42 = vadd.f32 %v1759_v38, %v1611_v39 }
 0xb53   : > { %v1612_v43 = vmul.f32 %v1758_v34, %v1603_v41  ;;  %1622 = vst.msk [vmem:[%s313_s10] sm:$0xff] %vm425_vm0, %v1620_v42 }
 0xb55   : > { %v1621_v44 = vadd.f32 %v1759_v38, %v1612_v43 }
 0xb57   : > { %1623 = vst.msk [vmem:[%s313_s10 + $0x8] sm:$0xff] %vm425_vm0, %v1621_v44 }
 0xb58   : > { %2020 = shalt.err (!%p2017_p3)
}
 0xb59   : > { %s2021_s21 = scalar_lea.hbm %s2404_s18, 256  ;;  %s2025_s22 = scalar_lea.hbm %s2458_s8, 512 }
 0xb5a   : > { %p2022_p4 = scmp.ne.s32.totalorder %s2404_s18, %s2021_s21  ;;  %p2026_p9 = scmp.lt.u32.totalorder %s2404_s18, %s2458_s8 }
 0xb5b   : > { %p2027_p10 = scmp.lt.u32.totalorder %s2025_s22, %s2021_s21  ;;  %p2029_p12 = scmp.lt.u32.totalorder %s2021_s21, %s2404_s18 }
 0xb5c   : > { %p2023_p7 = pnand %p2022_p4, %p2162_p5 }
 0xb5d   : > { %p2028_p11 = por %p2027_p10, %p2026_p9 }
 0xb5e   : > { %p2024_p8 = pneg %p2023_p7 }
 0xb5f   : > { %p2030_p13 = por %p2029_p12, %p2028_p11 }
 0xb61   : > { %p2031_p0 = pnand %p2030_p13, %p2024_p8 }
 0xb63   : > { %2034 = shalt.err (!%p2031_p0)
}
 0xb64   : > { %s2077_s17 = smov 128   ;;  %s2078_s9 = smov 8  }
 0xb65   : > { %1923 = dma.vmem_to_hbm [thread:$0]  (%p2162_p5), %s2406_s12, 256, %s2404_s18, %s2409_s20, %s2077_s17, %s2077_s17, %s2078_s9  }
 0xb66 PF: > { %p1929_p1 = scmp.ge.s32.totalorder %s2069_s30, 2  ;;  %s1653_s23 = sand.u32 1, %s2057_s27  }
 0xb67   : > { %s1654_s24 = scalar_lea.sflag [#allocation3], %s1653_s23 }
 0xb68   : > { %p1926_p2 = pnand %p1929_p1, %p2166_p6 }
 0xb6a   : > { %2052 = dma.done.wait (!%p1926_p2), %s1654_s24, 256  }
 0xb6b   : > { %2054 = vsyncadd (!%p1926_p2), %s1654_s24, 4294967040  ;;  %p18_p3 = scmp.ge.s32.totalorder %s2149_s11, 4   ;;  %s2463_s27 = smov %s2061_s28 }
 0xb6c   : > { %s2464_s28 = smov %s2065_s29  ;;  %s2465_s29 = smov %s2160_s14 }
 0xb6d   : > { %s2466_s30 = smov %s2149_s11  ;;  %20 = sbr.rel (!%p18_p3) target bundleno = 3 (0x3), region = 90 }
 0xb74   :  { %1659 = vsyncpa [#allocation3], 1 }
 0xb75   :  { %1661 = vsyncpa [#allocation3 + $0x1], 1 }

</bundles_post_ra>
